<compile_context>
chip_gen: v5e
topology: v5e:2x2
jax: 0.10.0
libtpu: 0.0.40
codegen_flags: <defaults>
</compile_context>

<pallas_src>
import jax
import jax.numpy as jnp
import numpy as np
from jax.experimental import pallas as pl
from jax.experimental.pallas import tpu as pltpu


# ----------------------------------------------------------------------------
# Kernel 1: generic dense (M, K) @ (K, N) + bias, bf16 MXU operands, f32 acc.
# Used for: hoisted LSTM input projection, highway convert layer.
# ----------------------------------------------------------------------------
def _dense_kernel(x_ref, w_ref, b_ref, out_ref):
    acc = jnp.dot(x_ref[...], w_ref[...], preferred_element_type=jnp.float32)
    out_ref[...] = (acc + b_ref[...]).astype(out_ref.dtype)


def dense(x2d, w_t, b, out_dtype=jnp.float32, tile_m=256):
    """x2d: (M, K) f32; w_t: (K, N); b: (N,).  Returns (M, N) f32."""
    M, K = x2d.shape
    N = w_t.shape[1]
    xb = x2d.astype(jnp.bfloat16)
    wb = w_t.astype(jnp.bfloat16)
    b2 = b.reshape(1, N).astype(jnp.float32)
    if M > tile_m and M % tile_m == 0:
        # Large-M path: tile rows, keep K/N whole (weights resident).
        grid_spec = pltpu.PrefetchScalarGridSpec(
            num_scalar_prefetch=0,
            grid=(M // tile_m,),
            in_specs=[
                pl.BlockSpec((tile_m, K), lambda i: (i, 0)),
                pl.BlockSpec((K, N), lambda i: (0, 0)),
                pl.BlockSpec((1, N), lambda i: (0, 0)),
            ],
            out_specs=pl.BlockSpec((tile_m, N), lambda i: (i, 0)),
        )
        return pl.pallas_call(
            _dense_kernel,
            out_shape=jax.ShapeDtypeStruct((M, N), out_dtype),
            grid_spec=grid_spec,
            compiler_params=pltpu.CompilerParams(
                dimension_semantics=("parallel",)),
        )(xb, wb, b2)
    # Small path: single block, whole arrays in VMEM.
    return pl.pallas_call(
        _dense_kernel,
        out_shape=jax.ShapeDtypeStruct((M, N), out_dtype),
    )(xb, wb, b2)


# ----------------------------------------------------------------------------
# Kernel 2: bidirectional LSTM recurrence (gates_x precomputed outside).
# grid = (direction, time-chunk); direction axis is "parallel".
# ----------------------------------------------------------------------------
def _bilstm_kernel(gx_ref, h0_ref, c0_ref, whh_ref, out_ref, hN_ref, cN_ref,
                   h_sc, c_sc):
    d = pl.program_id(0)            # 0 = forward, 1 = reverse
    c = pl.program_id(1)            # time-chunk index (sequential)
    T = gx_ref.shape[0]             # timesteps per chunk
    H = h_sc.shape[-1]

    @pl.when(c == 0)
    def _():
        h_sc[...] = h0_ref[...]
        c_sc[...] = c0_ref[...]

    whh = whh_ref[...]              # (H, 4H) bf16, resident across chunks

    def step(j, carry):
        h, c_st = carry
        # forward: t = j ; reverse: t = T-1-j  (no HBM reversal copies)
        t = j + d * (T - 1 - 2 * j)
        gates = gx_ref[t] + jnp.dot(h.astype(jnp.bfloat16), whh,
                                    preferred_element_type=jnp.float32)
        # PyTorch gate order i, f, g, o.  NOTE: with production H (multiple of
        # 128) these slices are lane-aligned; at H=32 they are intra-vreg.
        i_g = jax.nn.sigmoid(gates[:, 0 * H:1 * H])
        f_g = jax.nn.sigmoid(gates[:, 1 * H:2 * H])
        g_g = jnp.tanh(gates[:, 2 * H:3 * H])
        o_g = jax.nn.sigmoid(gates[:, 3 * H:4 * H])
        c_new = f_g * c_st + i_g * g_g
        h_new = o_g * jnp.tanh(c_new)
        out_ref[t] = h_new.astype(out_ref.dtype)
        return h_new, c_new

    h_fin, c_fin = jax.lax.fori_loop(0, T, step, (h_sc[...], c_sc[...]),
                                     unroll=True)
    h_sc[...] = h_fin
    c_sc[...] = c_fin

    # Final hidden/cell written once, on the last chunk only.
    @pl.when(c == pl.num_programs(1) - 1)
    def _():
        hN_ref[...] = h_fin.astype(hN_ref.dtype)
        cN_ref[...] = c_fin.astype(cN_ref.dtype)


def bilstm_recurrence(gx, h0, c0, whh_t, t_chunk=8):
    """gx: (2, L, B, 4H) f32 precomputed x@Wih^T + b (per direction);
    h0, c0: (2, B, H) f32; whh_t: (2, H, 4H) bf16.
    Returns out (2, L, B, H)  [out[1] already in original time order],
            hN (2, B, H), cN (2, B, H)."""
    _, L, B, G4 = gx.shape
    H = G4 // 4
    t_chunk = min(t_chunk, L)
    while L % t_chunk:
        t_chunk -= 1
    nc = L // t_chunk

    def seq_map(d, c):
        # forward direction reads chunk c, reverse reads chunk nc-1-c.
        return (d, c + d * (nc - 1 - 2 * c), 0, 0)

    grid_spec = pltpu.PrefetchScalarGridSpec(
        num_scalar_prefetch=0,
        grid=(2, nc),
        in_specs=[
            pl.BlockSpec((None, t_chunk, B, G4), seq_map),
            pl.BlockSpec((None, B, H), lambda d, c: (d, 0, 0)),
            pl.BlockSpec((None, B, H), lambda d, c: (d, 0, 0)),
            pl.BlockSpec((None, H, G4), lambda d, c: (d, 0, 0)),
        ],
        out_specs=[
            pl.BlockSpec((None, t_chunk, B, H), seq_map),
            pl.BlockSpec((None, B, H), lambda d, c: (d, 0, 0)),
            pl.BlockSpec((None, B, H), lambda d, c: (d, 0, 0)),
        ],
        scratch_shapes=[pltpu.VMEM((B, H), jnp.float32),
                        pltpu.VMEM((B, H), jnp.float32)],
    )
    return pl.pallas_call(
        _bilstm_kernel,
        out_shape=(jax.ShapeDtypeStruct((2, L, B, H), jnp.float32),
                   jax.ShapeDtypeStruct((2, B, H), jnp.float32),
                   jax.ShapeDtypeStruct((2, B, H), jnp.float32)),
        grid_spec=grid_spec,
        compiler_params=pltpu.CompilerParams(
            dimension_semantics=("parallel", "arbitrary")),
    )(gx, h0, c0, whh_t)


# ----------------------------------------------------------------------------
# Kernel 3: classification head  tanh -> max over seq -> tanh -> Linear(D, C).
# ----------------------------------------------------------------------------
def _head_kernel(x_ref, w_ref, b_ref, out_ref):
    t = jnp.tanh(x_ref[...])                    # (L, B, D)
    m = jnp.tanh(jnp.max(t, axis=0))            # (B, D)
    out = jnp.dot(m.astype(jnp.bfloat16), w_ref[...],
                  preferred_element_type=jnp.float32) + b_ref[...]
    out_ref[...] = out.astype(out_ref.dtype)


def head(x, w_out, b_out):
    """x: (L, B, D) f32; w_out: (C, D); b_out: (C,). Returns (B, C) f32."""
    L, B, D = x.shape
    C = w_out.shape[0]
    return pl.pallas_call(
        _head_kernel,
        out_shape=jax.ShapeDtypeStruct((B, C), jnp.float32),
    )(x, jnp.transpose(w_out).astype(jnp.bfloat16),
      b_out.reshape(1, C).astype(jnp.float32))


# ----------------------------------------------------------------------------
# HighwayBiLSTM block (one module of the nn.ModuleList).
# ----------------------------------------------------------------------------
def highway_block_forward(x, blk, hidden=None, t_chunk=8):
    """x: (L, B, Din). Returns info_flow (L, B, D), (h_n, c_n)."""
    L, B, _ = x.shape
    num_lstm = len(blk["lstm"])
    H = blk["lstm"][0][0][1].shape[1]           # w_hh: (4H, H)
    if hidden is None:                          # model re-inits zeros per block
        hidden = (jnp.zeros((2 * num_lstm, B, H), jnp.float32),
                  jnp.zeros((2 * num_lstm, B, H), jnp.float32))
    h0_all, c0_all = hidden

    layer_in = x
    h_list, c_list = [], []
    for l, ((wih_f, whh_f, b_f), (wih_r, whh_r, b_r)) in enumerate(blk["lstm"]):
        din = wih_f.shape[1]
        # Hoisted input projection, both directions in one big GEMM.
        w_cat = jnp.concatenate([jnp.transpose(wih_f), jnp.transpose(wih_r)],
                                axis=1)                         # (din, 8H)
        b_cat = jnp.concatenate([b_f, b_r], axis=0)             # (8H,)
        gx = dense(layer_in.reshape(L * B, din), w_cat, b_cat)  # (L*B, 8H)
        gx = jnp.transpose(gx.reshape(L, B, 2, 4 * H), (2, 0, 1, 3))
        whh_t = jnp.stack([jnp.transpose(whh_f), jnp.transpose(whh_r)],
                          axis=0).astype(jnp.bfloat16)          # (2, H, 4H)
        h0 = jnp.stack([h0_all[2 * l], h0_all[2 * l + 1]], axis=0)
        c0 = jnp.stack([c0_all[2 * l], c0_all[2 * l + 1]], axis=0)

        out, hN, cN = bilstm_recurrence(gx, h0, c0, whh_t, t_chunk=t_chunk)
        layer_in = jnp.concatenate([out[0], out[1]], axis=-1)   # (L, B, 2H)
        # TODO(synk): nn.LSTM inter-layer dropout (train-mode) not applied.
        h_list += [hN[0], hN[1]]
        c_list += [cN[0], cN[1]]
    h_n = jnp.stack(h_list, axis=0)
    c_n = jnp.stack(c_list, axis=0)

    # Highway gate x*sigmoid(Wx) + x*(1-sigmoid(Wx)) == x (and torch re-inits
    # the gate Linear every forward), so only the convert Linear remains —
    # lane-dense flattened GEMM, no HBM transpose.
    H2 = layer_in.shape[-1]
    y = dense(layer_in.reshape(L * B, H2), jnp.transpose(blk["w_conv"]),
              blk["b_conv"])
    return y.reshape(L, B, -1), (h_n, c_n)


# ----------------------------------------------------------------------------
# Full model forward.
# ----------------------------------------------------------------------------
def model_forward(token_ids, params, t_chunk=8):
    # Embedding gather as plain-JAX glue.
    # TODO(synk): dropout_embed / dropout are train-mode stochastic ops; this
    # is the eval-mode forward (identity).
    x = jnp.take(params["embed"], token_ids, axis=0)            # (L, B, D)
    for blk in params["highway"]:
        x, _hidden = highway_block_forward(x, blk, hidden=None,
                                           t_chunk=t_chunk)
    return head(x, params["w_out"], params["b_out"])            # (B, C)


# ----------------------------------------------------------------------------
# Pure-JAX reference (mirrors the bf16-operand / f32-accumulate math).
# ----------------------------------------------------------------------------
def _ref_dense(x2d, w_t, b):
    return jnp.dot(x2d.astype(jnp.bfloat16), w_t.astype(jnp.bfloat16),
                   preferred_element_type=jnp.float32) + b.astype(jnp.float32)


def reference_block(x, blk):
    L, B, _ = x.shape
    layer_in = x
    h_list, c_list = [], []
    for (wih_f, whh_f, b_f), (wih_r, whh_r, b_r) in blk["lstm"]:
        H = whh_f.shape[1]

        def run(seq, wih, whh, b):
            din = wih.shape[1]
            gxs = _ref_dense(seq.reshape(L * B, din), jnp.transpose(wih),
                             b).reshape(L, B, 4 * H)
            whh_t = jnp.transpose(whh).astype(jnp.bfloat16)

            def step(carry, g_t):
                h, c = carry
                g = g_t + jnp.dot(h.astype(jnp.bfloat16), whh_t,
                                  preferred_element_type=jnp.float32)
                i = jax.nn.sigmoid(g[:, :H])
                f = jax.nn.sigmoid(g[:, H:2 * H])
                gg = jnp.tanh(g[:, 2 * H:3 * H])
                o = jax.nn.sigmoid(g[:, 3 * H:])
                c = f * c + i * gg
                h = o * jnp.tanh(c)
                return (h, c), h

            z = jnp.zeros((B, H), jnp.float32)
            (hN, cN), out = jax.lax.scan(step, (z, z), gxs)
            return out, hN, cN

        out_f, hf, cf = run(layer_in, wih_f, whh_f, b_f)
        out_r, hr, cr = run(layer_in[::-1], wih_r, whh_r, b_r)
        layer_in = jnp.concatenate([out_f, out_r[::-1]], axis=-1)
        h_list += [hf, hr]
        c_list += [cf, cr]
    y = _ref_dense(layer_in.reshape(L * B, layer_in.shape[-1]),
                   jnp.transpose(blk["w_conv"]),
                   blk["b_conv"]).reshape(L, B, -1)
    return y, (jnp.stack(h_list, 0), jnp.stack(c_list, 0))


def reference_model(token_ids, params):
    x = jnp.take(params["embed"], token_ids, axis=0)
    for blk in params["highway"]:
        x, _ = reference_block(x, blk)
    m = jnp.tanh(jnp.max(jnp.tanh(x), axis=0))                  # (B, D)
    return _ref_dense(m, jnp.transpose(params["w_out"]), params["b_out"])


# ----------------------------------------------------------------------------
# Deterministic parameter init (shapes as in the module __init__).
# ----------------------------------------------------------------------------
def init_params(key, V, D, H, C, lstm_layers, highway_layers):
    ks = iter(jax.random.split(key, 128))
    scale = 1.0 / np.sqrt(H)

    def uni(k, shape, s=scale):
        return jax.random.uniform(k, shape, jnp.float32, -s, s)

    embed = 0.1 * jax.random.normal(next(ks), (V, D), jnp.float32)
    highway = []
    for _ in range(highway_layers):
        lstm = []
        for l in range(lstm_layers):
            din = D if l == 0 else 2 * H
            dirs = []
            for _ in range(2):                      # forward, reverse
                w_ih = uni(next(ks), (4 * H, din))
                w_hh = uni(next(ks), (4 * H, H))
                b = uni(next(ks), (4 * H,)) + uni(next(ks), (4 * H,))  # b_ih+b_hh
                dirs.append((w_ih, w_hh, b))
            lstm.append(tuple(dirs))
        # gate_layer / fc1 are dead (identity mix, re-inited every forward).
        w_conv = uni(next(ks), (D, 2 * H))
        b_conv = uni(next(ks), (D,))
        highway.append({"lstm": lstm, "w_conv": w_conv, "b_conv": b_conv})
    s_out = 1.0 / np.sqrt(D)
    w_out = uni(next(ks), (C, D), s_out)
    b_out = uni(next(ks), (C,), s_out)
    return {"embed": embed, "highway": highway, "w_out": w_out, "b_out": b_out}


if __name__ == "__main__":
    L, B, V, D, H, C = 8, 2, 50, 16, 32, 4
    lstm_layers, highway_layers = 1, 2

    key = jax.random.PRNGKey(0)
    k_ids, k_p = jax.random.split(key)
    token_ids = jax.random.randint(k_ids, (L, B), 0, V, dtype=jnp.int32)
    params = init_params(k_p, V, D, H, C, lstm_layers, highway_layers)

    logits = model_forward(token_ids, params)
    logits = jax.block_until_ready(logits)
    assert logits.shape == (B, C)

    # Block-level check (LSTM recurrence + convert kernels).
    x_emb = jnp.take(params["embed"], token_ids, axis=0)
    y_k, (h_k, c_k) = highway_block_forward(x_emb, params["highway"][0])
    y_k = jax.block_until_ready(y_k)
    y_r, (h_r, c_r) = reference_block(x_emb, params["highway"][0])
    np.testing.assert_allclose(np.asarray(y_k), np.asarray(y_r),
                               rtol=5e-3, atol=5e-3)
    np.testing.assert_allclose(np.asarray(h_k), np.asarray(h_r),
                               rtol=5e-3, atol=5e-3)
    np.testing.assert_allclose(np.asarray(c_k), np.asarray(c_r),
                               rtol=5e-3, atol=5e-3)

    # End-to-end check.
    ref_logits = reference_model(token_ids, params)
    np.testing.assert_allclose(np.asarray(logits), np.asarray(ref_logits),
                               rtol=5e-3, atol=5e-3)

    print("KERNEL_OK")
</pallas_src>

<mosaic_0001>
module attributes {stable_mosaic.version = 11 : i64} {
  func.func @_dense_kernel(%arg0: memref<16x16xbf16, #tpu.memory_space<vmem>>, %arg1: memref<16x256xbf16, #tpu.memory_space<vmem>>, %arg2: memref<1x256xf32, #tpu.memory_space<vmem>>, %arg3: memref<16x256xf32, #tpu.memory_space<vmem>>) attributes {dimension_semantics = [], scalar_prefetch = 0 : i64, scratch_operands = 0 : i64, tpu.core_type = #tpu.core_type<tc>} {
    %c0 = arith.constant 0 : index
    %c0_0 = arith.constant 0 : index
    %0 = vector.load %arg0[%c0, %c0_0] : memref<16x16xbf16, #tpu.memory_space<vmem>>, vector<16x16xbf16>
    %c0_1 = arith.constant 0 : index
    %c0_2 = arith.constant 0 : index
    %1 = vector.load %arg1[%c0_1, %c0_2] : memref<16x256xbf16, #tpu.memory_space<vmem>>, vector<16x256xbf16>
    %cst = arith.constant dense<0.000000e+00> : vector<16x256xf32>
    %2 = tpu.matmul %0, %1, %cst {dimension_numbers = #tpu.dot_dimension_numbers<[1], [0], [0], [1], [0, 0, 1, 1], [], []>} : vector<16x16xbf16>, vector<16x256xbf16>, vector<16x256xf32> -> vector<16x256xf32>
    %c0_3 = arith.constant 0 : index
    %c0_4 = arith.constant 0 : index
    %3 = vector.load %arg2[%c0_3, %c0_4] : memref<1x256xf32, #tpu.memory_space<vmem>>, vector<1x256xf32>
    %4 = vector.broadcast %3 : vector<1x256xf32> to vector<16x256xf32>
    %5 = arith.addf %2, %4 : vector<16x256xf32>
    %c0_5 = arith.constant 0 : index
    %c0_6 = arith.constant 0 : index
    %6 = vector.load %arg3[%c0_5, %c0_6] : memref<16x256xf32, #tpu.memory_space<vmem>>, vector<16x256xf32>
    tpu.vector_store %arg3[%c0_5, %c0_6], %5 {strides = array<i32>} : memref<16x256xf32, #tpu.memory_space<vmem>>, vector<16x256xf32>,
    return
  }
}

</mosaic_0001>

<bundles_post_ra>
// kernel: tpu_custom_call.1
= control target key start
LH: loop header
LB: loop body
LE: loop exit
PB: predicated region body
PF: predicated region fallthrough
CT: control target
= control target key end

     0   :  { %8 = vsyncpa [#allocation3], 0  ;;  %s313_s0 = inlined_call_operand.hbm [shape: bf16[16,16], index: 0, kind: input, shape index: {}]   ;;  %s314_s1 = inlined_call_operand.hbm [shape: bf16[16,256], index: 1, kind: input, shape index: {}]   ;;  %s315_s2 = inlined_call_operand.hbm [shape: f32[1,256], index: 2, kind: input, shape index: {}]   ;;  %s316_s3 = inlined_call_operand.hbm [shape: f32[16,256], index: 3, kind: output, shape index: {}]  }
   0x1   :  { %9 = vsyncpa [#allocation6], 0  ;;  %s28_s14 = sshll.u32 %s314_s1, 4  ;;  %s29_s14 = int_to_ptr.hbm [resolvable:$true] %s28_s14 }
   0x2   :  { %10 = vsyncpa [#allocation4], 0  ;;  %s271_s15 = smov [#allocation5]   ;;  %s15_s19 = sshll.u32 %s313_s0, 4  ;;  %s16_s19 = int_to_ptr.hbm [resolvable:$true] %s15_s19 }
   0x3   :  { %s30_s16 = sshll.u32 %s271_s15, 4  ;;  %s272_s20 = smov 128   ;;  %s31_s16 = int_to_ptr.vmem [resolvable:$true] %s30_s16 }
   0x4   :  { %s273_s21 = smov 8   ;;  %s274_s22 = smov [#allocation2]  }
   0x5   :  { %36 = dma.hbm_to_vmem [thread:$0]  %s29_s14, 256, %s31_s16, [#allocation6], %s272_s20, %s272_s20, %s273_s21  }
   0x6   :  { %s17_s23 = sshll.u32 %s274_s22, 4  ;;  %s275_s24 = smov 64   ;;  %s18_s23 = int_to_ptr.vmem [resolvable:$true] %s17_s23 }
   0x7   :  { %s276_s25 = smov 4   ;;  %s42_s27 = sshll.u32 %s315_s2, 4  ;;  %s43_s27 = int_to_ptr.hbm [resolvable:$true] %s42_s27 }
   0x8   :  { %23 = dma.hbm_to_vmem [thread:$0]  %s16_s19, 128, %s18_s23, [#allocation3], %s275_s24, %s275_s24, %s276_s25  }
   0x9   :  { %s277_s28 = smov [#allocation7]  }
   0xa   :  { %s44_s29 = sshll.u32 %s277_s28, 4  ;;  %s45_s29 = int_to_ptr.vmem [resolvable:$true] %s44_s29 }
   0xb   :  { %47 = dma.hbm_to_vmem [thread:$0]  %s43_s27, 32, %s45_s29, [#allocation6]  }
   0xc   :  { %265 = dma.done.wait [#allocation3], 128  }
   0xd   :  { %266 = vsyncadd [#allocation3], 4294967168 }
   0xe   :  { %267 = dma.done.wait [#allocation6], 288  }
   0xf   :  { %268 = vsyncadd [#allocation6], 4294967008  ;;  %v148_v0 = vld [vmem:[#allocation5] sm:$0xf]  ;;  %v158_v1 = vld [vmem:[#allocation5 + $0x4] sm:$0xf0] }
  0x10   :  { %v157_v2 = vld [vmem:[#allocation5 + $0x4] sm:$0xf]  ;;  %v149_v3 = vor.u32 %v158_v1, %v148_v0  ;;  %v150_v4 = vld [vmem:[#allocation5 + $0x8] sm:$0xf0]  ;;  %v156_v6 = vld [vmem:[#allocation2] sm:$0xff]  ;;  %vm86_vm0 = vcmask 130048  }
  0x11   :  { %v153_v5 = vor.u32 %v157_v2, %v150_v4  ;;  %v65_v7 = vld [vmem:[#allocation7] sm:$0x3]  ;;  %s278_s0 = smov [#allocation8]   ;;  %s128_s5 = sshll.u32 %s316_s3, 4  ;;  %s129_s5 = int_to_ptr.hbm [resolvable:$true] %s128_s5 }
  0x12   :  { %97 = vmatpush.bf16.msra.mxu0 %v149_v3  ;;  %v67_v8 = vperm.slane %v65_v7, 0  ;;  %v68_v9 = vperm.slane %v65_v7, 1  ;;  %s126_s2 = sshll.u32 %s278_s0, 4  ;;  %s279_s6 = smov 256   ;;  %s127_s2 = int_to_ptr.vmem [resolvable:$true] %s126_s2 }
  0x13   :  { %111 = vmatpush.bf16.msra.mxu1 %v153_v5  ;;  %s280_s7 = smov 16  }
  0x15   :  { %154 = vmatmul.msk.bf16.vlgmr.msra.gmra.mxu0 %vm86_vm0, %v156_v6 }
  0x16   :  { %155 = vmatmul.msk.bf16.vlgmr.msra.gmra.mxu1 %vm86_vm0, %v156_v6 }
  0x92   :  { %v99_v10 = vpop.f32.mrf.mxu0 }
  0x93   :  { %v100_v11 = vadd.f32 %v99_v10, %v67_v8  ;;  %v113_v12 = vpop.f32.mrf.mxu1 }
  0x94   :  { %v114_v13 = vadd.f32 %v113_v12, %v68_v9 }
  0x95   :  { %118 = vst [vmem:[#allocation8] sm:$0xff] %v100_v11 }
  0x96   :  { %119 = vst [vmem:[#allocation8 + $0x8] sm:$0xff] %v114_v13 }
  0x9a   :  { %v101_v14 = vpop.f32.mrf.mxu0 }
  0x9b   :  { %v102_v15 = vadd.f32 %v101_v14, %v67_v8  ;;  %v115_v16 = vpop.f32.mrf.mxu1 }
  0x9c   :  { %v116_v17 = vadd.f32 %v115_v16, %v68_v9 }
  0x9d   :  { %120 = vst [vmem:[#allocation8 + $0x10] sm:$0xff] %v102_v15 }
  0x9e   :  { %121 = vst [vmem:[#allocation8 + $0x18] sm:$0xff] %v116_v17 }
  0x9f   :  { %134 = dma.vmem_to_hbm [thread:$0]  %s127_s2, 512, %s129_s5, [#allocation4], %s279_s6, %s279_s6, %s280_s7  }
  0xa0   :  { %269 = dma.done.wait [#allocation4], 512  }
  0xa1   :  { %270 = vsyncadd [#allocation4], 4294966784 }
  0xa2   :  { %139 = vsyncpa [#allocation3], 1 }
  0xa3   :  { %140 = vsyncpa [#allocation6], 1 }
  0xa4   :  { %141 = vsyncpa [#allocation4], 1 }

</bundles_post_ra>
